<compile_context>
chip_gen: v7x
topology: tpu7x:2x2x1
jax: 0.10.0
libtpu: 0.0.40
codegen_flags: <defaults>
</compile_context>

<pallas_src>
import functools

import jax
import jax.numpy as jnp
import numpy as np
from jax.experimental import pallas as pl
from jax.experimental.pallas import tpu as pltpu


def _round_up(a, b):
    return -(-a // b) * b


def _cdiv(a, b):
    return -(-a // b)


def _pick_tile_m(m_dense, halo):
    """Phase-1 lane-tile width.

    Per-step VMEM here is only ~100s of KiB, far below every chip's scoped
    limit, so the tile is sized to amortize the ~0.35us/grid-step overhead.
    Prefer >= 4 tiles (>= 2 per TensorCore on v7x megacore), then >= 2 tiles
    (pipelining), else one right-sized tile for tiny inputs.  tile_m must be a
    multiple of `halo` so the halo BlockSpec index arithmetic is exact.
    """
    for min_tiles in (4, 2):
        for t in (2048, 1024, 512, 256, 128):
            if t % halo == 0 and m_dense >= min_tiles * t:
                return t
    return _round_up(min(max(m_dense, 128), 2048), halo)


def _pick_tile2(m_pad):
    """Phase-2 lane-tile width: pure streaming pass -> as wide as practical."""
    if m_pad <= 8192:
        return m_pad
    for t in (8192, 4096, 2048, 1024, 512, 256, 128):
        if m_pad % t == 0:
            return t
    return 128  # unreachable: m_pad is a multiple of 128


# ---------------------------------------------------------------------------
# Phase 1: conv as ONE stacked-K GEMM + masked per-channel, per-lane partial
# statistics.
# ---------------------------------------------------------------------------
def _conv_stats_kernel(x_ref, halo_ref, w_ref, mask_ref, y_ref, psum_ref,
                       psumsq_ref, *, tap_offsets, tile_m):
    cout_p = y_ref.shape[0]
    # Main tile + right halo so every tap's shifted window is in-tile.
    x = jnp.concatenate([x_ref[...], halo_ref[...]], axis=1)  # (cin_p, tm+halo)
    # Stack all KH*KW shifted windows along the contraction axis and issue a
    # single MXU dot with K = KH*KW*cin_p (instead of KH*KW tiny K=cin_p dots).
    rhs = jnp.concatenate([x[:, off:off + tile_m] for off in tap_offsets],
                          axis=0)                             # (K, tile_m)
    acc = jnp.dot(w_ref[...], rhs, preferred_element_type=jnp.float32)
    y_ref[...] = acc.astype(y_ref.dtype)          # lane-dense (cout_p, tile_m)

    # Per-channel partial sums over *valid* output columns only (mask zeroes
    # padded-grid / stride-off-lattice / tail-padding columns).  Partials are
    # kept per lane (lane-aligned VPU adds only, no XLU cross-lane reduce);
    # the tiny remaining reduction happens in f32 XLA glue.
    msk = mask_ref[...].astype(jnp.float32)       # (1, tile_m) of {0, 1}
    ym = acc * msk
    ysq = ym * acc
    ps = jnp.zeros((cout_p, 128), jnp.float32)
    pq = jnp.zeros((cout_p, 128), jnp.float32)
    for b in range(tile_m // 128):                # statically unrolled
        sl = slice(b * 128, (b + 1) * 128)
        ps = ps + ym[:, sl]
        pq = pq + ysq[:, sl]
    psum_ref[0] = ps
    psumsq_ref[0] = pq


# ---------------------------------------------------------------------------
# Phase 2: y * scale + shift, then LeakyReLU (wide streaming pass over y^T).
# ---------------------------------------------------------------------------
def _bn_lrelu_kernel(y_ref, scale_ref, shift_ref, o_ref, *, negative_slope):
    yn = y_ref[...].astype(jnp.float32) * scale_ref[...] + shift_ref[...]
    o_ref[...] = jnp.where(yn >= 0, yn, negative_slope * yn).astype(o_ref.dtype)


@functools.partial(
    jax.jit,
    static_argnames=("stride", "padding", "negative_slope", "eps",
                     "compute_dtype"))
def conv_bn_relu(x, conv_weight, bn_gamma, bn_beta, *, stride, padding,
                 negative_slope, eps=1e-5, compute_dtype=jnp.bfloat16):
    """Forward of ConvBnReLU. x: (N, Cin, H, W); returns (N, Cout, OH, OW)."""
    N, Cin, H, W = x.shape
    Cout, _, KH, KW = conv_weight.shape
    Hp, Wp = H + 2 * padding, W + 2 * padding
    OH = (Hp - KH) // stride + 1
    OW = (Wp - KW) // stride + 1

    cin_p = _round_up(Cin, 8)
    cout_p = _round_up(Cout, 8)
    m_dense = N * Hp * Wp                     # dense (padded, stride-1) grid
    off_max = (KH - 1) * Wp + (KW - 1)        # largest tap shift
    halo = _round_up(max(off_max, 1), 128)    # right-halo columns per tile
    tile_m = _pick_tile_m(m_dense, halo)
    num_tiles = _cdiv(m_dense, tile_m)
    m_pad = num_tiles * tile_m
    k_total = KH * KW * cin_p
    tap_offsets = tuple(kh * Wp + kw for kh in range(KH) for kw in range(KW))

    # Channel-major, spatially padded, flattened input (+ `halo` zero columns
    # so the last tile's halo block is in-bounds).  No im2col blowup and no
    # re-tiled gather copy: the same array feeds both the main and the halo
    # BlockSpec of phase 1.
    xp = jnp.pad(x, ((0, 0), (0, 0), (padding, padding), (padding, padding)))
    x_cm = jnp.transpose(xp, (1, 0, 2, 3)).reshape(Cin, m_dense)
    x_cm = jnp.pad(x_cm, ((0, cin_p - Cin), (0, m_pad + halo - m_dense)))
    x_cm = x_cm.astype(compute_dtype)

    # Weights folded into a single (cout_p, KH*KW*cin_p) slab; the column order
    # (tap-major, cin within tap) must match the RHS stacking in the kernel.
    w_r = jnp.transpose(conv_weight, (0, 2, 3, 1)).reshape(Cout, KH * KW, Cin)
    w_r = jnp.pad(w_r, ((0, cout_p - Cout), (0, 0), (0, cin_p - Cin)))
    w_stacked = w_r.reshape(cout_p, k_total).astype(compute_dtype)

    # Validity mask over the dense padded grid (stride lattice + window bound),
    # shipped as bf16 (exact 0/1 values) to halve its HBM stream.
    i_ok = (jnp.arange(Hp) % stride == 0) & (jnp.arange(Hp) < OH * stride)
    j_ok = (jnp.arange(Wp) % stride == 0) & (jnp.arange(Wp) < OW * stride)
    mask_img = (i_ok[:, None] & j_ok[None, :]).reshape(-1)
    mask = jnp.pad(jnp.tile(mask_img, N), (0, m_pad - m_dense))
    mask = mask.astype(jnp.bfloat16).reshape(1, m_pad)

    cparams = pltpu.CompilerParams(
        dimension_semantics=("parallel",),      # v7x: split tiles over 2 TCs
        vmem_limit_bytes=32 * 1024 * 1024)      # safe on v5e / v6e / v7x

    itemsize = jnp.dtype(compute_dtype).itemsize
    cost1 = pl.CostEstimate(
        flops=2 * cout_p * k_total * m_pad + 6 * cout_p * m_pad,
        transcendentals=0,
        bytes_accessed=((m_pad + num_tiles * halo) * cin_p * itemsize
                        + w_stacked.size * itemsize + m_pad * 2
                        + cout_p * m_pad * itemsize
                        + 2 * num_tiles * cout_p * 128 * 4))

    halo_blocks_per_tile = tile_m // halo       # exact by construction
    y_t, psum, psumsq = pl.pallas_call(
        functools.partial(_conv_stats_kernel, tap_offsets=tap_offsets,
                          tile_m=tile_m),
        out_shape=(
            jax.ShapeDtypeStruct((cout_p, m_pad), compute_dtype),        # y^T
            jax.ShapeDtypeStruct((num_tiles, cout_p, 128), jnp.float32),
            jax.ShapeDtypeStruct((num_tiles, cout_p, 128), jnp.float32)),
        grid=(num_tiles,),
        in_specs=[
            pl.BlockSpec((cin_p, tile_m), lambda m: (0, m)),             # main
            pl.BlockSpec((cin_p, halo),                                  # halo
                         lambda m: (0, (m + 1) * halo_blocks_per_tile)),
            pl.BlockSpec((cout_p, k_total), lambda m: (0, 0)),           # W
            pl.BlockSpec((1, tile_m), lambda m: (0, m)),                 # mask
        ],
        out_specs=(
            pl.BlockSpec((cout_p, tile_m), lambda m: (0, m)),
            pl.BlockSpec((1, cout_p, 128), lambda m: (m, 0, 0)),
            pl.BlockSpec((1, cout_p, 128), lambda m: (m, 0, 0)),
        ),
        compiler_params=cparams,
        cost_estimate=cost1,
    )(x_cm, x_cm, w_stacked, mask)

    # --- tiny cross-tile + cross-lane stat reduction, BN affine folding (f32) --
    # TODO(synk): variance uses the one-pass E[y^2]-E[y]^2 formula in f32; a
    # centered second pass would be more robust when |mean| >> std.
    count = float(N * OH * OW)
    ch_sum = jnp.sum(psum, axis=(0, 2))         # (cout_p,)
    ch_sumsq = jnp.sum(psumsq, axis=(0, 2))
    mean = ch_sum / count
    var = jnp.maximum(ch_sumsq / count - mean * mean, 0.0)  # biased batch var
    inv = jax.lax.rsqrt(var + eps)
    gamma_p = jnp.pad(bn_gamma.astype(jnp.float32), (0, cout_p - Cout))
    beta_p = jnp.pad(bn_beta.astype(jnp.float32), (0, cout_p - Cout))
    scale = (gamma_p * inv).reshape(cout_p, 1)
    shift = (beta_p - mean * gamma_p * inv).reshape(cout_p, 1)

    out_dtype = x.dtype
    tile2 = _pick_tile2(m_pad)                  # wide streaming tile
    out_itemsize = jnp.dtype(out_dtype).itemsize
    cost2 = pl.CostEstimate(
        flops=4 * cout_p * m_pad, transcendentals=0,
        bytes_accessed=cout_p * m_pad * (itemsize + out_itemsize))
    alias = {0: 0} if jnp.dtype(compute_dtype) == jnp.dtype(out_dtype) else {}
    y_bn = pl.pallas_call(
        functools.partial(_bn_lrelu_kernel, negative_slope=negative_slope),
        out_shape=jax.ShapeDtypeStruct((cout_p, m_pad), out_dtype),
        grid=(m_pad // tile2,),
        in_specs=[
            pl.BlockSpec((cout_p, tile2), lambda m: (0, m)),
            pl.BlockSpec((cout_p, 1), lambda m: (0, 0)),
            pl.BlockSpec((cout_p, 1), lambda m: (0, 0)),
        ],
        out_specs=pl.BlockSpec((cout_p, tile2), lambda m: (0, m)),
        input_output_aliases=alias,             # in place when dtypes match
        compiler_params=cparams,
        cost_estimate=cost2,
    )(y_t, scale, shift)

    # --- gather valid columns; channel-major -> cheap leading-axis transpose --
    # TODO(synk): for stride>1, compact y^T to valid columns between the phases
    # (or have phase 2 consume only valid columns via a prefetch-driven index
    # map) to avoid streaming the stride^2-larger dense grid through the
    # epilogue and this crop.
    y4 = y_bn[:Cout, :m_dense].reshape(Cout, N, Hp, Wp)
    y4 = y4[:, :, :(OH - 1) * stride + 1:stride, :(OW - 1) * stride + 1:stride]
    return jnp.transpose(y4, (1, 0, 2, 3))      # (N, Cout, OH, OW)


def _reference(x, w, gamma, beta, *, stride, padding, negative_slope,
               eps=1e-5, compute_dtype=jnp.float32):
    # Mirrors the kernel's quantization points: compute_dtype MXU inputs, f32
    # accumulation + statistics, y^T stored in compute_dtype before the affine
    # + LeakyReLU epilogue.
    y = jax.lax.conv_general_dilated(
        x.astype(compute_dtype), w.astype(compute_dtype),
        window_strides=(stride, stride),
        padding=[(padding, padding), (padding, padding)],
        dimension_numbers=("NCHW", "OIHW", "NCHW"),
        preferred_element_type=jnp.float32)
    mean = jnp.mean(y, axis=(0, 2, 3), keepdims=True)
    var = jnp.mean((y - mean) ** 2, axis=(0, 2, 3), keepdims=True)
    scale = gamma.reshape(1, -1, 1, 1) * jax.lax.rsqrt(var + eps)
    shift = beta.reshape(1, -1, 1, 1) - mean * scale
    y_q = y.astype(compute_dtype).astype(jnp.float32)
    yn = y_q * scale + shift
    return jnp.where(yn >= 0, yn, negative_slope * yn)


if __name__ == "__main__":
    # Module hyperparameters (momentum only affects running-stat updates, which
    # do not change the training-mode forward output).
    in_channels, out_channels = 4, 8
    kernel_size, stride, padding = 3, 1, 1
    momentum, negative_slope = 0.1, 0.1

    key = jax.random.PRNGKey(0)
    kx, kw, kg, kb = jax.random.split(key, 4)
    x = jax.random.normal(kx, (2, in_channels, 16, 16), dtype=jnp.float32)
    conv_weight = 0.1 * jax.random.normal(
        kw, (out_channels, in_channels, kernel_size, kernel_size),
        dtype=jnp.float32)
    bn_gamma = 1.0 + 0.1 * jax.random.normal(kg, (out_channels,), jnp.float32)
    bn_beta = 0.1 * jax.random.normal(kb, (out_channels,), jnp.float32)

    # Default path: bf16 MXU operands + bf16 y^T, f32 accumulation/statistics.
    out = conv_bn_relu(x, conv_weight, bn_gamma, bn_beta,
                       stride=stride, padding=padding,
                       negative_slope=negative_slope)
    out = jax.block_until_ready(out)
    # Full-f32 path (bit-close to the f32 PyTorch module).
    out_f32 = conv_bn_relu(x, conv_weight, bn_gamma, bn_beta,
                           stride=stride, padding=padding,
                           negative_slope=negative_slope,
                           compute_dtype=jnp.float32)
    out_f32 = jax.block_until_ready(out_f32)

    assert out.shape == (2, out_channels, 16, 16)
    ref_f32 = _reference(x, conv_weight, bn_gamma, bn_beta, stride=stride,
                         padding=padding, negative_slope=negative_slope,
                         compute_dtype=jnp.float32)
    ref_bf16 = _reference(x, conv_weight, bn_gamma, bn_beta, stride=stride,
                          padding=padding, negative_slope=negative_slope,
                          compute_dtype=jnp.bfloat16)
    # f32 path must match the exact PyTorch-style math tightly.
    assert np.allclose(np.asarray(out_f32), np.asarray(ref_f32),
                       atol=1e-4, rtol=1e-4)
    # bf16 path is checked against a reference with the same quantization
    # points; remaining differences are accumulation order and rare 1-ulp bf16
    # rounding flips, hence the looser tolerance.
    assert np.allclose(np.asarray(out), np.asarray(ref_bf16),
                       atol=2e-2, rtol=2e-2)
    print("KERNEL_OK")
</pallas_src>

<mosaic_0001>
module attributes {stable_mosaic.version = 11 : i64} {
  func.func @_conv_stats_kernel(%arg0: i32, %arg1: memref<8x128xbf16, #tpu.memory_space<vmem>>, %arg2: memref<8x128xbf16, #tpu.memory_space<vmem>>, %arg3: memref<8x72xbf16, #tpu.memory_space<vmem>>, %arg4: memref<1x128xbf16, #tpu.memory_space<vmem>>, %arg5: memref<8x128xbf16, #tpu.memory_space<vmem>>, %arg6: memref<1x8x128xf32, #tpu.memory_space<vmem>>, %arg7: memref<1x8x128xf32, #tpu.memory_space<vmem>>) attributes {dimension_semantics = [#tpu.dimension_semantics<parallel>], iteration_bounds = array<i64: 6>, scalar_prefetch = 0 : i64, scratch_operands = 0 : i64, tpu.core_type = #tpu.core_type<tc>, window_params = [{transform_indices = @transform_0, window_bounds = array<i64: 8, 128>}, {transform_indices = @transform_1, window_bounds = array<i64: 8, 128>}, {pipeline_mode = #tpu.pipeline_mode<synchronous>, transform_indices = @transform_2, window_bounds = array<i64: 8, 72>}, {transform_indices = @transform_3, window_bounds = array<i64: 1, 128>}, {transform_indices = @transform_4, window_bounds = array<i64: 8, 128>}, {transform_indices = @transform_5, window_bounds = array<i64: 1, 8, 128>}, {transform_indices = @transform_6, window_bounds = array<i64: 1, 8, 128>}]} {
    %c0 = arith.constant 0 : index
    %c0_0 = arith.constant 0 : index
    %0 = vector.load %arg1[%c0, %c0_0] : memref<8x128xbf16, #tpu.memory_space<vmem>>, vector<8x128xbf16>
    %c0_1 = arith.constant 0 : index
    %c0_2 = arith.constant 0 : index
    %1 = vector.load %arg2[%c0_1, %c0_2] : memref<8x128xbf16, #tpu.memory_space<vmem>>, vector<8x128xbf16>
    %2 = tpu.concatenate %0, %1 in 1 : vector<8x128xbf16>, vector<8x128xbf16> -> vector<8x256xbf16>
    %3 = vector.extract_strided_slice %2 {offsets = [0, 0], sizes = [8, 128], strides = [1, 1]} : vector<8x256xbf16> to vector<8x128xbf16>
    %4 = vector.extract_strided_slice %2 {offsets = [0, 1], sizes = [8, 128], strides = [1, 1]} : vector<8x256xbf16> to vector<8x128xbf16>
    %5 = vector.extract_strided_slice %2 {offsets = [0, 2], sizes = [8, 128], strides = [1, 1]} : vector<8x256xbf16> to vector<8x128xbf16>
    %6 = vector.extract_strided_slice %2 {offsets = [0, 18], sizes = [8, 128], strides = [1, 1]} : vector<8x256xbf16> to vector<8x128xbf16>
    %7 = vector.extract_strided_slice %2 {offsets = [0, 19], sizes = [8, 128], strides = [1, 1]} : vector<8x256xbf16> to vector<8x128xbf16>
    %8 = vector.extract_strided_slice %2 {offsets = [0, 20], sizes = [8, 128], strides = [1, 1]} : vector<8x256xbf16> to vector<8x128xbf16>
    %9 = vector.extract_strided_slice %2 {offsets = [0, 36], sizes = [8, 128], strides = [1, 1]} : vector<8x256xbf16> to vector<8x128xbf16>
    %10 = vector.extract_strided_slice %2 {offsets = [0, 37], sizes = [8, 128], strides = [1, 1]} : vector<8x256xbf16> to vector<8x128xbf16>
    %11 = vector.extract_strided_slice %2 {offsets = [0, 38], sizes = [8, 128], strides = [1, 1]} : vector<8x256xbf16> to vector<8x128xbf16>
    %12 = tpu.concatenate %3, %4, %5, %6, %7, %8, %9, %10, %11 in 0 : vector<8x128xbf16>, vector<8x128xbf16>, vector<8x128xbf16>, vector<8x128xbf16>, vector<8x128xbf16>, vector<8x128xbf16>, vector<8x128xbf16>, vector<8x128xbf16>, vector<8x128xbf16> -> vector<72x128xbf16>
    %c0_3 = arith.constant 0 : index
    %c0_4 = arith.constant 0 : index
    %13 = vector.load %arg3[%c0_3, %c0_4] : memref<8x72xbf16, #tpu.memory_space<vmem>>, vector<8x72xbf16>
    %cst = arith.constant dense<0.000000e+00> : vector<8x128xf32>
    %14 = tpu.matmul %13, %12, %cst {dimension_numbers = #tpu.dot_dimension_numbers<[1], [0], [0], [1], [0, 0, 1, 1], [], []>} : vector<8x72xbf16>, vector<72x128xbf16>, vector<8x128xf32> -> vector<8x128xf32>
    %15 = arith.truncf %14 : vector<8x128xf32> to vector<8x128xbf16>
    %c0_5 = arith.constant 0 : index
    %c0_6 = arith.constant 0 : index
    %16 = vector.load %arg5[%c0_5, %c0_6] : memref<8x128xbf16, #tpu.memory_space<vmem>>, vector<8x128xbf16>
    tpu.vector_store %arg5[%c0_5, %c0_6], %15 {strides = array<i32>} : memref<8x128xbf16, #tpu.memory_space<vmem>>, vector<8x128xbf16>,
    %c0_7 = arith.constant 0 : index
    %c0_8 = arith.constant 0 : index
    %17 = vector.load %arg4[%c0_7, %c0_8] : memref<1x128xbf16, #tpu.memory_space<vmem>>, vector<1x128xbf16>
    %18 = arith.extf %17 : vector<1x128xbf16> to vector<1x128xf32>
    %19 = vector.broadcast %18 : vector<1x128xf32> to vector<8x128xf32>
    %20 = arith.mulf %14, %19 : vector<8x128xf32>
    %21 = arith.mulf %20, %14 : vector<8x128xf32>
    %cst_9 = arith.constant 0.000000e+00 : f32
    %22 = vector.broadcast %cst_9 : f32 to vector<8x128xf32>
    %cst_10 = arith.constant 0.000000e+00 : f32
    %23 = vector.broadcast %cst_10 : f32 to vector<8x128xf32>
    %24 = arith.addf %22, %20 : vector<8x128xf32>
    %25 = arith.addf %23, %21 : vector<8x128xf32>
    %c0_11 = arith.constant 0 : index
    %c0_12 = arith.constant 0 : index
    %c0_13 = arith.constant 0 : index
    %26 = vector.load %arg6[%c0_11, %c0_12, %c0_13] : memref<1x8x128xf32, #tpu.memory_space<vmem>>, vector<1x8x128xf32>
    %27 = vector.shape_cast %26 : vector<1x8x128xf32> to vector<8x128xf32>
    %28 = vector.shape_cast %24 : vector<8x128xf32> to vector<1x8x128xf32>
    tpu.vector_store %arg6[%c0_11, %c0_12, %c0_13], %28 {strides = array<i32>} : memref<1x8x128xf32, #tpu.memory_space<vmem>>, vector<1x8x128xf32>,
    %c0_14 = arith.constant 0 : index
    %c0_15 = arith.constant 0 : index
    %c0_16 = arith.constant 0 : index
    %29 = vector.load %arg7[%c0_14, %c0_15, %c0_16] : memref<1x8x128xf32, #tpu.memory_space<vmem>>, vector<1x8x128xf32>
    %30 = vector.shape_cast %29 : vector<1x8x128xf32> to vector<8x128xf32>
    %31 = vector.shape_cast %25 : vector<8x128xf32> to vector<1x8x128xf32>
    tpu.vector_store %arg7[%c0_14, %c0_15, %c0_16], %31 {strides = array<i32>} : memref<1x8x128xf32, #tpu.memory_space<vmem>>, vector<1x8x128xf32>,
    return
  }
  func.func @transform_0(%arg0: i32) -> (i32, i32) {
    %c0_i32 = arith.constant 0 : i32
    %c0_i32_0 = arith.constant 0 : i32
    return %c0_i32, %arg0 : i32, i32
  }
  func.func @transform_1(%arg0: i32) -> (i32, i32) {
    %c1_i32 = arith.constant 1 : i32
    %0 = arith.addi %arg0, %c1_i32 : i32
    %c1_i32_0 = arith.constant 1 : i32
    %1 = arith.muli %0, %c1_i32_0 : i32
    %c0_i32 = arith.constant 0 : i32
    %c0_i32_1 = arith.constant 0 : i32
    return %c0_i32, %1 : i32, i32
  }
  func.func @transform_2(%arg0: i32) -> (i32, i32) {
    %c0_i32 = arith.constant 0 : i32
    %c0_i32_0 = arith.constant 0 : i32
    %c0_i32_1 = arith.constant 0 : i32
    return %c0_i32, %c0_i32_0 : i32, i32
  }
  func.func @transform_3(%arg0: i32) -> (i32, i32) {
    %c0_i32 = arith.constant 0 : i32
    %c0_i32_0 = arith.constant 0 : i32
    return %c0_i32, %arg0 : i32, i32
  }
  func.func @transform_4(%arg0: i32) -> (i32, i32) {
    %c0_i32 = arith.constant 0 : i32
    %c0_i32_0 = arith.constant 0 : i32
    return %c0_i32, %arg0 : i32, i32
  }
  func.func @transform_5(%arg0: i32) -> (i32, i32, i32) {
    %c0_i32 = arith.constant 0 : i32
    %c0_i32_0 = arith.constant 0 : i32
    %c0_i32_1 = arith.constant 0 : i32
    return %arg0, %c0_i32, %c0_i32_0 : i32, i32, i32
  }
  func.func @transform_6(%arg0: i32) -> (i32, i32, i32) {
    %c0_i32 = arith.constant 0 : i32
    %c0_i32_0 = arith.constant 0 : i32
    %c0_i32_1 = arith.constant 0 : i32
    return %arg0, %c0_i32, %c0_i32_0 : i32, i32, i32
  }
}

module attributes {stable_mosaic.version = 11 : i64} {
  func.func @_bn_lrelu_kernel(%arg0: i32, %arg1: memref<8x768xbf16, #tpu.memory_space<vmem>>, %arg2: memref<8x1xf32, #tpu.memory_space<vmem>>, %arg3: memref<8x1xf32, #tpu.memory_space<vmem>>, %arg4: memref<8x768xf32, #tpu.memory_space<vmem>>) attributes {dimension_semantics = [#tpu.dimension_semantics<parallel>], iteration_bounds = array<i64: 1>, scalar_prefetch = 0 : i64, scratch_operands = 0 : i64, tpu.core_type = #tpu.core_type<tc>, window_params = [{transform_indices = @transform_0, window_bounds = array<i64: 8, 768>}, {pipeline_mode = #tpu.pipeline_mode<synchronous>, transform_indices = @transform_1, window_bounds = array<i64: 8, 1>}, {pipeline_mode = #tpu.pipeline_mode<synchronous>, transform_indices = @transform_2, window_bounds = array<i64: 8, 1>}, {transform_indices = @transform_3, window_bounds = array<i64: 8, 768>}]} {
    %c0 = arith.constant 0 : index
    %c0_0 = arith.constant 0 : index
    %0 = vector.load %arg1[%c0, %c0_0] : memref<8x768xbf16, #tpu.memory_space<vmem>>, vector<8x768xbf16>
    %1 = arith.extf %0 : vector<8x768xbf16> to vector<8x768xf32>
    %c0_1 = arith.constant 0 : index
    %c0_2 = arith.constant 0 : index
    %2 = vector.load %arg2[%c0_1, %c0_2] : memref<8x1xf32, #tpu.memory_space<vmem>>, vector<8x1xf32>
    %3 = vector.broadcast %2 : vector<8x1xf32> to vector<8x768xf32>
    %4 = arith.mulf %1, %3 : vector<8x768xf32>
    %c0_3 = arith.constant 0 : index
    %c0_4 = arith.constant 0 : index
    %5 = vector.load %arg3[%c0_3, %c0_4] : memref<8x1xf32, #tpu.memory_space<vmem>>, vector<8x1xf32>
    %6 = vector.broadcast %5 : vector<8x1xf32> to vector<8x768xf32>
    %7 = arith.addf %4, %6 : vector<8x768xf32>
    %cst = arith.constant 0.000000e+00 : f32
    %8 = vector.broadcast %cst : f32 to vector<8x768xf32>
    %9 = arith.cmpf oge, %7, %8 : vector<8x768xf32>
    %cst_5 = arith.constant 1.000000e-01 : f32
    %10 = vector.broadcast %cst_5 : f32 to vector<8x768xf32>
    %11 = arith.mulf %10, %7 : vector<8x768xf32>
    %12 = arith.select %9, %7, %11 : vector<8x768xi1>, vector<8x768xf32>
    %c0_6 = arith.constant 0 : index
    %c0_7 = arith.constant 0 : index
    %13 = vector.load %arg4[%c0_6, %c0_7] : memref<8x768xf32, #tpu.memory_space<vmem>>, vector<8x768xf32>
    tpu.vector_store %arg4[%c0_6, %c0_7], %12 {strides = array<i32>} : memref<8x768xf32, #tpu.memory_space<vmem>>, vector<8x768xf32>,
    return
  }
  func.func @transform_0(%arg0: i32) -> (i32, i32) {
    %c0_i32 = arith.constant 0 : i32
    %c0_i32_0 = arith.constant 0 : i32
    return %c0_i32, %arg0 : i32, i32
  }
  func.func @transform_1(%arg0: i32) -> (i32, i32) {
    %c0_i32 = arith.constant 0 : i32
    %c0_i32_0 = arith.constant 0 : i32
    %c0_i32_1 = arith.constant 0 : i32
    return %c0_i32, %c0_i32_0 : i32, i32
  }
  func.func @transform_2(%arg0: i32) -> (i32, i32) {
    %c0_i32 = arith.constant 0 : i32
    %c0_i32_0 = arith.constant 0 : i32
    %c0_i32_1 = arith.constant 0 : i32
    return %c0_i32, %c0_i32_0 : i32, i32
  }
  func.func @transform_3(%arg0: i32) -> (i32, i32) {
    %c0_i32 = arith.constant 0 : i32
    %c0_i32_0 = arith.constant 0 : i32
    return %c0_i32, %arg0 : i32, i32
  }
}

</mosaic_0001>

<bundles_post_ra>
// kernel: tile.6
= control target key start
LH: loop header
LB: loop body
LE: loop exit
PB: predicated region body
PF: predicated region fallthrough
CT: control target
= control target key end

     0   :  { %v33_v4 = vmov 0   ;;  %s56_s0 = inlined_call_operand.vmem [shape: pred[324], index: 0, kind: input, shape index: {}]   ;;  %s57_s1 = inlined_call_operand.vmem [shape: pred[2,324], index: 1, kind: output, shape index: {}]  }
   0x1   :  { %v4_v0 = vld [vmem:[%s56_s0] ss:$0 sm:$0xff] }
   0x2   :  { %v7_v1 = vand.u32 255, %v4_v0  ;;  %v14_v2 = vshra.s32 %v4_v0, 8  ;;  %v23_v3 = vshra.s32 %v4_v0, 16 }
   0x4   :  { %v8_v5 = vpack.c.b16 %v33_v4, %v7_v1  ;;  %v15_v6 = vand.u32 255, %v14_v2  ;;  %v24_v7 = vand.u32 255, %v23_v3 }
   0x6   :  { %v9_v8 = vpack.c.b8 %v33_v4, %v8_v5  ;;  %v17_v9 = vpack.c.b16 %v33_v4, %v15_v6  ;;  %v26_v10 = vpack.c.b16 %v33_v4, %v24_v7 }
   0x8   :  { %11 = vst [vmem:[%s57_s1] sm:$0x1] %v9_v8  ;;  %v18_v11 = vpack.c.b8 %v33_v4, %v17_v9  ;;  %v27_v12 = vpack.c.b8 %v33_v4, %v26_v10 }
   0xa   :  { %30 = vst [vmem:[%s57_s1 + $0x1] sm:$0x1] %v18_v11  ;;  %31 = vst [vmem:[%s57_s1 + $0x2] sm:$0x1] %v27_v12 }

// kernel: tile.7
= control target key start
LH: loop header
LB: loop body
LE: loop exit
PB: predicated region body
PF: predicated region fallthrough
CT: control target
= control target key end

     0   :  { %vm61_vm0 = vcmask 490496   ;;  %vm51_vm1 = vcmask 556032   ;;  %s72_s12 = smov 3  ;;  %s93_s13 = smov 68   ;;  %vm65_vm2 = vcmask 64512   ;;  %vm68_vm3 = vcmask 1048096   ;;  %s119_s0 = inlined_call_operand.vmem [shape: pred[2,324], index: 0, kind: input, shape index: {}]   ;;  %s120_s1 = inlined_call_operand.vmem [shape: pred[648], index: 1, kind: output, shape index: {}]  }
   0x1   :  { %v89_v0 = vld [vmem:[%s119_s0 + $0x2] sm:$0x1]  ;;  %v90_v1 = vld [vmem:[%s119_s0 + $0x1] sm:$0x1]  ;;  %v43_v2 = vld [vmem:[%s119_s0] sm:$0x1] }
   0x2   :  { %v15_v3 = vunpack.c.0.s8 %v89_v0  ;;  %v30_v4 = vunpack.c.0.s8 %v90_v1  ;;  %v44_v5 = vunpack.c.0.s8 %v43_v2  ;;  %s54_s0 = smov 3  ;;  %v94_v15 = vmov 0  }
   0x4   :  { %20 = vst [vmem:[#allocation1 + $0x10] sm:$0xf] %v15_v3  ;;  %35 = vst [vmem:[#allocation1 + $0x8] sm:$0xf] %v30_v4 }
   0x5   :  { %48 = vst [vmem:[#allocation1] sm:$0xf] %v44_v5 }
   0xb   :  { %v58_v6 = vld [vmem:[#allocation1 + $0x11] sm:$0x1]   ;;  %v50_v10 = vld [vmem:[#allocation1 + $0x10] sm:$0x1]  }
   0xc   :  { %v60_v7 = vld [vmem:[#allocation1 + $0x1] ss:$8 sm:$0x7]   ;;  %v55_v9 = vld [vmem:[#allocation1] ss:$8 sm:%s54_s0]  }
   0xd   :  { %v62_v8 = vsel %vm61_vm0, %v60_v7, %v58_v6  ;;  %56 = vst [vmem:[#allocation0] sm:$0x3] %v55_v9   ;;  %53 = vst.msk [vmem:[#allocation0 + $0x2] sm:$0x1] %vm51_vm1, %v50_v10   ;;  %v73_v11 = vld [vmem:[#allocation1 + $0x1] ss:$8 sm:%s72_s12]  }
   0xe   :  { %63 = vrot.lane.b32.xlu0 %v62_v8, %s93_s13 }
  0x12   :  { %74 = vrot.lane.b32.xlu0 %v73_v11, %s93_s13 }
  0x80   :  { %v64_v12 = vpop.permute.xlu0 %63  }
  0x81   :  { %67 = vst.msk [vmem:[#allocation0 + $0x5] sm:$0x1] %vm65_vm2, %v64_v12  }
  0x82   :  { %70 = vst.msk [vmem:[#allocation0 + $0x2] sm:$0x7] %vm68_vm3, %v64_v12  }
  0x84   :  { %v75_v13 = vpop.permute.xlu0 %74  }
  0x85   :  { %78 = vst.msk [vmem:[#allocation0 + $0x3] sm:$0x3] %vm51_vm1, %v75_v13  }
  0x8c   :  { %v83_v14 = vld [vmem:[#allocation0] sm:$0xff] }
  0x8d   :  { %v85_v16 = vpack.c.b16 %v94_v15, %v83_v14 }
  0x8f   :  { %v86_v17 = vpack.c.b8 %v94_v15, %v85_v16 }
  0x91   :  { %87 = vst [vmem:[%s120_s1] sm:$0x3] %v86_v17 }

// kernel: conv_bn_relu.3
= control target key start
LH: loop header
LB: loop body
LE: loop exit
PB: predicated region body
PF: predicated region fallthrough
CT: control target
= control target key end

     0   :  { %v77_v0 = vmov 0   ;;  %s131_s1 = inlined_call_operand.vmem [shape: f32[8,1], index: 1, kind: input, shape index: {}]   ;;  %s132_s2 = inlined_call_operand.vmem [shape: f32[8,1], index: 2, kind: input, shape index: {}]   ;;  %s133_s0 = inlined_call_operand.vmem [shape: bf16[8,768], index: 0, kind: input, shape index: {}]   ;;  %s134_s3 = inlined_call_operand.vmem [shape: f32[8,768], index: 3, kind: output, shape index: {}]  }
   0x1   :  { %76 = vset.pattern.permute.xlu0 %v77_v0  ;;  %v23_v1 = vld [vmem:[%s131_s1] sm:$0xff]  ;;  %v15_v4 = vld [vmem:[%s133_s0 + $0x8] sm:$0xff]  ;;  %v16_v5 = vld [vmem:[%s133_s0 + $0x10] sm:$0xff] }
   0x2   :  { %26 = vperm.xlu0 %76, %v23_v1   ;;  %v35_v2 = vld [vmem:[%s132_s2] sm:$0xff]  ;;  %v19_v8 = vunpack.c.l.bf16 %v15_v4  ;;  %v20_v9 = vunpack.c.h.bf16 %v15_v4  ;;  %v21_v11 = vunpack.c.l.bf16 %v16_v5  ;;  %v22_v12 = vunpack.c.h.bf16 %v16_v5 }
   0x3   :  { %v14_v3 = vld [vmem:[%s133_s0] sm:$0xff] }
   0x4   :  { %v17_v6 = vunpack.c.l.bf16 %v14_v3  ;;  %v18_v7 = vunpack.c.h.bf16 %v14_v3 }
   0x6   :  { %38 = vperm.xlu0 %76, %v35_v2  }
  0x81   :  { %v27_v10 = vpop.permute.xlu0 %26 }
  0x82   :  { %v29_v13 = vmul.f32 %v27_v10, %v17_v6  ;;  %v30_v14 = vmul.f32 %v27_v10, %v18_v7  ;;  %v31_v15 = vmul.f32 %v27_v10, %v19_v8  ;;  %v32_v16 = vmul.f32 %v27_v10, %v20_v9 }
  0x83   :  { %v33_v18 = vmul.f32 %v27_v10, %v21_v11  ;;  %v34_v19 = vmul.f32 %v27_v10, %v22_v12 }
  0x85   :  { %v39_v17 = vpop.permute.xlu0 %38 }
  0x86   :  { %v41_v20 = vadd.f32 %v39_v17, %v29_v13  ;;  %v42_v21 = vadd.f32 %v39_v17, %v30_v14  ;;  %v43_v22 = vadd.f32 %v39_v17, %v31_v15  ;;  %v44_v23 = vadd.f32 %v39_v17, %v32_v16 }
  0x87   :  { %v45_v24 = vadd.f32 %v39_v17, %v33_v18  ;;  %v46_v25 = vadd.f32 %v39_v17, %v34_v19 }
  0x88   :  { %vm47_vm0 = vcmp.ge.f32.partialorder %v41_v20, 0.0  ;;  %vm48_vm1 = vcmp.ge.f32.partialorder %v42_v21, 0.0  ;;  %vm49_vm2 = vcmp.ge.f32.partialorder %v43_v22, 0.0  ;;  %vm50_vm3 = vcmp.ge.f32.partialorder %v44_v23, 0.0 }
  0x89   :  { %vm51_vm4 = vcmp.ge.f32.partialorder %v45_v24, 0.0  ;;  %vm52_vm5 = vcmp.ge.f32.partialorder %v46_v25, 0.0  ;;  %v53_v26 = vmul.f32 0.1, %v41_v20  ;;  %v54_v27 = vmul.f32 0.1, %v42_v21 }
  0x8a   :  { %v55_v28 = vmul.f32 0.1, %v43_v22  ;;  %v56_v29 = vmul.f32 0.1, %v44_v23  ;;  %v57_v30 = vmul.f32 0.1, %v45_v24 }
  0x8b   :  { %v58_v31 = vmul.f32 0.1, %v46_v25  ;;  %v59_v32 = vsel %vm47_vm0, %v41_v20, %v53_v26  ;;  %v60_v33 = vsel %vm48_vm1, %v42_v21, %v54_v27 }
  0x8c   :  { %v61_v34 = vsel %vm49_vm2, %v43_v22, %v55_v28  ;;  %v62_v35 = vsel %vm50_vm3, %v44_v23, %v56_v29  ;;  %v63_v36 = vsel %vm51_vm4, %v45_v24, %v57_v30  ;;  %65 = vst [vmem:[%s134_s3] sm:$0xff] %v59_v32  ;;  %66 = vst [vmem:[%s134_s3 + $0x8] sm:$0xff] %v60_v33 }
  0x8d   :  { %v64_v37 = vsel %vm52_vm5, %v46_v25, %v58_v31  ;;  %67 = vst [vmem:[%s134_s3 + $0x10] sm:$0xff] %v61_v34  ;;  %68 = vst [vmem:[%s134_s3 + $0x18] sm:$0xff] %v62_v35 }
  0x8e   :  { %69 = vst [vmem:[%s134_s3 + $0x20] sm:$0xff] %v63_v36  ;;  %70 = vst [vmem:[%s134_s3 + $0x28] sm:$0xff] %v64_v37 }

// kernel: conv_bn_relu.2
= control target key start
LH: loop header
LB: loop body
LE: loop exit
PB: predicated region body
PF: predicated region fallthrough
CT: control target
= control target key end

     0   :  { %s680_s21 = smov 0   ;;  %s730_s0 = inlined_call_operand.vmem [shape: bf16[8,896], index: 0, kind: input, shape index: {}, may-alias: {0,1}]   ;;  %s731_s1 = inlined_call_operand.vmem [shape: bf16[8,896], index: 1, kind: input, shape index: {}, may-alias: {0,1}]   ;;  %s732_s2 = inlined_call_operand.vmem [shape: bf16[8,72], index: 2, kind: input, shape index: {}]   ;;  %s733_s3 = inlined_call_operand.vmem [shape: bf16[1,768], index: 3, kind: input, shape index: {}]   ;;  %s734_s4 = inlined_call_operand.vmem [shape: bf16[8,768], index: 4, kind: output, shape index: {0}]   ;;  %s735_s5 = inlined_call_operand.vmem [shape: f32[6,8,128], index: 5, kind: output, shape index: {1}]   ;;  %s736_s6 = inlined_call_operand.vmem [shape: f32[6,8,128], index: 6, kind: output, shape index: {2}]  }
   0x1 LB: > { %s686_s22 = sadd.s32 4294967295, %s633_s21   ;;  %p580_p0 = scmp.ge.s32.totalorder %s633_s21, 1  ;;  %s633_s21 = sphi %s680_s21, %s17_s21  }
   0x2   : > { %p237_p1 = scmp.lt.s32.totalorder %s633_s21, 7 }
   0x4   : > { %p238_p2 = pnand %p580_p0, %p237_p1 }
   0x5   : > { %p281_p3 = scmp.lt.s32.totalorder (!%p238_p2), %s686_s22, 6  ;;  %s285_s23 = sadd.s32 (!%p238_p2), 1, %s686_s22  ;;  %v635_v0 = vmov (!%p238_p2), 0.0   ;;  %vm642_vm0 = vmmov (!%p238_p2), 0   ;;  %vm317_vm1 = vcmask (!%p238_p2), 1039360   ;;  %vm329_vm2 = vcmask (!%p238_p2), 900096  }
   0x6   : > { %241 = sbr.rel (%p238_p2) target bundleno = 385 (0x181), region = 36  ;;  %p286_p4 = scmp.lt.s32.totalorder (!%p238_p2), %s285_s23, 6  ;;  %595 = vmatprep.subr.bf16.mxu0 (!%p238_p2), %v635_v0  ;;  %605 = vmatprep.mubr.msk.bf16.mxu0 (!%p238_p2), %vm642_vm0, %v635_v0  ;;  %vm361_vm3 = vcmask (!%p238_p2), 1043456   ;;  %vm323_vm4 = vcmask (!%p238_p2), 1031168   ;;  %vm335_vm5 = vcmask (!%p238_p2), 891904   ;;  %vm341_vm6 = vcmask (!%p238_p2), 883712  }
   0x7   : > { %s636_s29 = smov (!%p238_p2), 126   ;;  %s637_s7 = smov (!%p238_p2), 127   ;;  %vm347_vm7 = vcmask (!%p238_p2), 752640   ;;  %vm353_vm8 = vcmask (!%p238_p2), 744448   ;;  %vm359_vm9 = vcmask (!%p238_p2), 736256   ;;  %vm379_vm10 = vcmask (!%p238_p2), 588800  }
   0x8   : > { %s638_s11 = smov (!%p238_p2), 110   ;;  %s639_s12 = smov (!%p238_p2), 109   ;;  %v378_v34 = vld [vmem:[%s732_s2] sm:$0xf] (!%p238_p2)  ;;  %v430_v35 = vlaneseq (!%p238_p2) }
   0x9   : > { %s640_s13 = smov (!%p238_p2), 108   ;;  %s641_s14 = smov (!%p238_p2), 92  }
   0xa   : > { %s643_s15 = smov (!%p238_p2), 91   ;;  %s644_s16 = smov (!%p238_p2), 90   ;;  %v431_v36 = vshrl.u32 (!%p238_p2), %v430_v35, 7 }
   0xb   : > { %p291_p5 = scmp.lt.s32.totalorder (!%p238_p2), %s686_s22, 5 }
   0xc   : > { %v432_v39 = vsub.s32 (!%p238_p2), 0, %v431_v36 }
   0xd   : > { %s282_s24 = scalar_select %p281_p3, %s686_s22, 6 }
   0xe   : > { %s738_s23 = smov (!%p286_p4, %s285_s23), 6  ;;  %s740_s22 = smov (!%p291_p5, %s686_s22), 5 }
   0xf   : > { %s581_s25 = sshll.u32 %s282_s24, 2  ;;  %s582_s30 = sshll.u32 %s738_s23, 2 }
  0x10   : > { %s284_s28 = scalar_lea.vmem %s730_s0, %s581_s25  ;;  %s289_s10 = scalar_lea.vmem %s731_s1, %s582_s30 }
  0x11   : > { %v307_v1 = vld [vmem:[%s284_s28] sm:$0xf]  ;;  %s293_s23 = scalar_lea.vmem %s733_s3, %s740_s22  ;;  %s583_s24 = sshll.u32 %s740_s22, 2 }
  0x12   : > { %319 = vrot.lane.b32.xlu1 %v307_v1, %s636_s29  ;;  %v311_v2 = vrot.slane %v307_v1, 4  ;;  %v308_v3 = vld [vmem:[%s289_s10] sm:$0xf]  ;;  %s584_s25 = sshll.u32 %s740_s22, 3  ;;  %s297_s28 = scalar_lea.vmem %s734_s4, %s583_s24 }
  0x13   : > { %v312_v4 = vrot.slane %v308_v3, 4  ;;  %v428_v37 = vld [vmem:[%s293_s23] sm:$0x1]  ;;  %s305_s10 = scalar_lea.vmem %s736_s6, %s584_s25 }
  0x14   : > { %313 = vrot.lane.b32.xlu0 %v311_v2, %s637_s7  ;;  %v429_v38 = vunpack.c.l.bf16 %v428_v37 }
  0x16   : > { %321 = vrot.lane.b32.xlu1 %v308_v3, %s636_s29  ;;  %v433_v40 = vrot.slane %v429_v38, %v432_v39 }
  0x18   : > { %325 = vrot.lane.b32.xlu0 %v311_v2, %s638_s11 }
  0x1a   : > { %327 = vrot.lane.b32.xlu1 %v312_v4, %s638_s11 }
  0x1c   : > { %315 = vrot.lane.b32.xlu0 %v312_v4, %s637_s7  ;;  %s301_s7 = scalar_lea.vmem %s735_s5, %s584_s25 }
  0x1e   : > { %333 = vrot.lane.b32.xlu1 %v308_v3, %s639_s12 }
  0x20   : > { %331 = vrot.lane.b32.xlu0 %v307_v1, %s639_s12 }
  0x22   : > { %339 = vrot.lane.b32.xlu1 %v312_v4, %s640_s13 }
  0x24   : > { %337 = vrot.lane.b32.xlu0 %v311_v2, %s640_s13 }
  0x26   : > { %345 = vrot.lane.b32.xlu1 %v308_v3, %s641_s14 }
  0x28   : > { %343 = vrot.lane.b32.xlu0 %v307_v1, %s641_s14 }
  0x2a   : > { %351 = vrot.lane.b32.xlu1 %v312_v4, %s643_s15 }
  0x2c   : > { %349 = vrot.lane.b32.xlu0 %v311_v2, %s643_s15 }
  0x2e   : > { %357 = vrot.lane.b32.xlu1 %v308_v3, %s644_s16 }
  0x30   : > { %355 = vrot.lane.b32.xlu0 %v307_v1, %s644_s16 }
  0x84   : > { %v320_v5 = vpop.permute.xlu1 %319 }
  0x86   : > { %v314_v6 = vpop.permute.xlu0 %313 }
  0x88   : > { %v322_v7 = vpop.permute.xlu1 %321 }
  0x89   : > { %v324_v16 = vsel %vm323_vm4, %v320_v5, %v322_v7 }
  0x8a   : > { %v326_v8 = vpop.permute.xlu0 %325 }
  0x8c   : > { %v328_v9 = vpop.permute.xlu1 %327 }
  0x8d   : > { %v330_v14 = vsel %vm329_vm2, %v326_v8, %v328_v9 }
  0x8e   : > { %v316_v10 = vpop.permute.xlu0 %315  ;;  %v368_v17 = vsel %vm361_vm3, %v324_v16, %v330_v14 }
  0x8f   : > { %v318_v11 = vsel %vm317_vm1, %v314_v6, %v316_v10 }
  0x90   : > { %v364_v12 = vsel %vm361_vm3, %v307_v1, %v318_v11  ;;  %v334_v13 = vpop.permute.xlu1 %333 }
  0x91   : > { %596 = vmatpush3.bf16.msra.mxu0 %v364_v12 }
  0x92   : > { %v332_v15 = vpop.permute.xlu0 %331  ;;  %597 = vmatprep.subr.bf16.mxu0 %v635_v0 }
  0x93   : > { %v336_v20 = vsel %vm335_vm5, %v332_v15, %v334_v13 }
  0x94   : > { %v340_v18 = vpop.permute.xlu1 %339 }
  0x95   : > { %598 = vmatpush3.bf16.msra.mxu0 %v368_v17 }
  0x96   : > { %v338_v19 = vpop.permute.xlu0 %337  ;;  %599 = vmatprep.subr.bf16.mxu0 %v635_v0 }
  0x97   : > { %v342_v21 = vsel %vm341_vm6, %v338_v19, %v340_v18 }
  0x98   : > { %v372_v22 = vsel %vm361_vm3, %v336_v20, %v342_v21  ;;  %v346_v23 = vpop.permute.xlu1 %345 }
  0x99   : > { %600 = vmatpush3.bf16.msra.mxu0 %v372_v22 }
  0x9a   : > { %v344_v24 = vpop.permute.xlu0 %343  ;;  %601 = vmatprep.subr.bf16.mxu0 %v635_v0 }
  0x9b   : > { %v348_v27 = vsel %vm347_vm7, %v344_v24, %v346_v23 }
  0x9c   : > { %v352_v25 = vpop.permute.xlu1 %351 }
  0x9e   : > { %v350_v26 = vpop.permute.xlu0 %349 }
  0x9f   : > { %v354_v28 = vsel %vm353_vm8, %v350_v26, %v352_v25 }
  0xa0   : > { %v376_v29 = vsel %vm361_vm3, %v348_v27, %v354_v28  ;;  %v358_v30 = vpop.permute.xlu1 %357 }
  0xa1   : > { %602 = vmatpush3.bf16.msra.mxu0 %v376_v29 }
  0xa2   : > { %v356_v31 = vpop.permute.xlu0 %355  ;;  %603 = vmatprep.subr.bf16.mxu0 %v635_v0 }
  0xa3   : > { %v360_v32 = vsel %vm359_vm9, %v356_v31, %v358_v30 }
  0xa4   : > { %v384_v33 = vsel %vm361_vm3, %v360_v32, 0 }
  0xa5   : > { %604 = vmatpush3.bf16.msra.mxu0 %v384_v33 }
  0xa8   : > { %606 = vmatmul.mubr.msk.bf16.vlgmr.msra.gmra.mrb[0].mxu0 %vm379_vm10, %v378_v34 }
 0x17b   : > { %v420_v41 = vpop.f32.mrb[0].mxu0 }
 0x17c   : > { %v426_v42 = vpack.c.bf16 %v420_v41, %v420_v41  ;;  %v434_v43 = vmul.f32 %v433_v40, %v420_v41  ;;  %v607_v44 = vpop.f32.mrb[1].mxu0 }
 0x17d   : > { %v423_v45 = vpop.f32.mrb[2].mxu0 }
 0x17e   : > { %427 = vst [vmem:[%s297_s28] sm:$0xf] %v426_v42  ;;  %v435_v46 = vmul.f32 %v434_v43, %v420_v41  ;;  %438 = vst [vmem:[%s301_s7] sm:$0xff] %v434_v43  ;;  %v608_v47 = vpop.f32.mrb[3].mxu0 }
 0x180   : > { %439 = vst [vmem:[%s305_s10] sm:$0xff] %v435_v46 }
 0x181 PF: > { %s17_s21 = sadd.s32 1, %s633_s21  }
 0x182   : > { %p14_p6 = scmp.ge.s32.totalorder %s17_s21, 8  }
 0x184   :  { %16 = sbr.rel (!%p14_p6) target bundleno = 1 (0x1), region = 96 }

</bundles_post_ra>
